<compile_context>
chip_gen: v5e
topology: v5e:2x2
jax: 0.10.0
libtpu: 0.0.40
codegen_flags: <defaults>
</compile_context>

<pallas_src>
import math

import jax
import jax.numpy as jnp
from jax import lax
from jax.experimental import pallas as pl
from jax.experimental.pallas import tpu as pltpu


MASK_VAL = -1e30      # additive logit value for non-edges / padding
M_INIT = -0.5e30      # running-max floor (> MASK_VAL so masked exp underflows to 0)
SLOPE = 0.01          # F.leaky_relu default negative_slope


def _round_up(x, m):
    return ((x + m - 1) // m) * m


# --------------------------------------------------------------------------- #
# Stage 1: fused projection.  acc = h @ W_pad ; z = bf16(acc);
# scores ride in the last two columns of W_pad and are emitted as a tiny f32 slab.
# --------------------------------------------------------------------------- #
def proj_kernel(h_ref, w_ref, z_ref, s_ref):
    acc = jnp.dot(h_ref[...], w_ref[...], preferred_element_type=jnp.float32)
    z_ref[...] = acc.astype(z_ref.dtype)      # bf16, lane-dense store
    s_ref[...] = acc[:, -8:]                  # f32; cols 6,7 = (a_src.z, a_dst.z)


# --------------------------------------------------------------------------- #
# Stage 2: masked-softmax attention + aggregation, online softmax over src tiles,
# with per-tile sparsity skipping via a scalar-prefetched occupancy bitmap.
# --------------------------------------------------------------------------- #
def make_attn_kernel(tile_src, n_src, z_resident, ragged_src):
    def attn_kernel(occ_ref, s_dst_ref, s_src_ref, adj_ref, z_ref, out_ref,
                    m_sc, l_sc, acc_sc):
        di = pl.program_id(0)
        si = pl.program_id(1)
        n_si = pl.num_programs(1)

        @pl.when(si == 0)
        def _init():
            m_sc[...] = jnp.full_like(m_sc, M_INIT)
            l_sc[...] = jnp.zeros_like(l_sc)
            acc_sc[...] = jnp.zeros_like(acc_sc)

        # Skip tiles with no edges (exact: their contribution is identically 0).
        @pl.when(occ_ref[di * n_si + si] > 0)
        def _update():
            # Edge logits: leaky_relu(a_dst.z_v + a_src.z_u)
            logits = s_dst_ref[...] + s_src_ref[...]        # (TD,1)+(1,TS) -> (TD,TS)
            lr = jnp.maximum(logits, SLOPE * logits)        # leaky_relu
            mask = adj_ref[...] != 0
            if ragged_src:                                  # mask ragged tail columns
                col = lax.broadcasted_iota(jnp.int32, (1, tile_src), 1)
                mask = mask & (si * tile_src + col < n_src)
            e = jnp.where(mask, lr, MASK_VAL)

            # Online (flash-style) softmax accumulation across src tiles.
            m_prev = m_sc[...]
            m_new = jnp.maximum(m_prev, jnp.max(e, axis=-1, keepdims=True))
            scale = jnp.exp(m_prev - m_new)
            p = jnp.exp(e - m_new)                          # masked entries underflow to 0
            if z_resident:
                start = pl.multiple_of(si * tile_src, tile_src)
                z_blk = z_ref[pl.ds(start, tile_src), :]
            else:
                z_blk = z_ref[...]
            l_sc[...] = scale * l_sc[...] + jnp.sum(p, axis=-1, keepdims=True)
            # bf16 x bf16 MXU matmul with f32 accumulation.
            acc_sc[...] = scale * acc_sc[...] + jnp.dot(
                p.astype(z_blk.dtype), z_blk, preferred_element_type=jnp.float32)
            m_sc[...] = m_new

        @pl.when(si == n_si - 1)
        def _finalize():
            # Deferred normalization: one (approx, EUP) reciprocal per dst row.
            # Rows with no edges output 0 (reference would give NaN) -- see header.
            inv = pl.reciprocal(jnp.maximum(l_sc[...], 1e-30), approx=True)
            out_ref[...] = (acc_sc[...] * inv).astype(out_ref.dtype)

    return attn_kernel


# --------------------------------------------------------------------------- #
# Wrapper
# --------------------------------------------------------------------------- #
def gat_layer(h, fc_weight, attn_weight, adj, use_residual=False,
              tile_dst=1024, tile_src=2048, z_resident=None,
              vmem_limit_bytes=48 * 1024 * 1024):
    """h: (N_src, in_dim); fc_weight: (out_dim, in_dim) as in nn.Linear;
    attn_weight: (1, 2*out_dim); adj[dst, src] nonzero == edge (int8/bool preferred;
    dst nodes are the first N_dst src nodes as in a DGL block)."""
    n_src, in_dim = h.shape
    out_dim = fc_weight.shape[0]
    n_dst = adj.shape[0]
    assert adj.shape[1] == n_src and n_dst <= n_src

    f32, bf16 = jnp.float32, jnp.bfloat16

    out_pad = _round_up(out_dim, 128)          # lane-dense z / output
    if out_pad - out_dim < 2:                  # need 2 free cols for folded scores
        out_pad += 128                         # TODO(synk): separate tiny score dot instead
    tile_src = min(tile_src, _round_up(n_src, 128))
    tile_dst = min(tile_dst, _round_up(n_dst, 32))
    # v7x megacore: prefer >= 2 dst tiles so the "parallel" dst axis splits across
    # both TensorCores.
    if n_dst > 256 and tile_dst >= n_dst:
        tile_dst = _round_up((n_dst + 1) // 2, 32)
    n_src_pad = _round_up(n_src, tile_src)
    n_dst_pad = _round_up(n_dst, tile_dst)
    nd_t = n_dst_pad // tile_dst
    ns_t = n_src_pad // tile_src
    ragged_src = (n_src % tile_src) != 0

    # Keep the whole bf16 z VMEM-resident when it fits comfortably (largest win on
    # v5e/v6e; budget is conservative enough for v7x's 64 MiB VMEM as well).
    z_bytes = n_src_pad * out_pad * 2
    if z_resident is None:
        z_resident = (2 * z_bytes) <= (vmem_limit_bytes // 3)

    # ---- parameter prep (O(N*D) / O(D^2) in XLA, negligible vs the N^2 kernel) ----
    h_pad = jnp.zeros((n_src_pad, in_dim), f32).at[:n_src].set(h.astype(f32))
    w_t = fc_weight.astype(f32).T                          # (in_dim, out_dim)
    a_src = attn_weight[0, :out_dim].astype(f32)
    a_dst = attn_weight[0, out_dim:].astype(f32)
    w_pad = (jnp.zeros((in_dim, out_pad), f32)
             .at[:, :out_dim].set(w_t)
             .at[:, out_pad - 2].set(w_t @ a_src)          # folded score columns
             .at[:, out_pad - 1].set(w_t @ a_dst))

    # ---- stage 1: fused projection + attention scores (one MXU push per tile) ----
    z_pad, s_all = pl.pallas_call(
        proj_kernel,
        grid=(n_src_pad // tile_src,),
        in_specs=[
            pl.BlockSpec((tile_src, in_dim), lambda i: (i, 0)),
            pl.BlockSpec((in_dim, out_pad), lambda i: (0, 0)),
        ],
        out_specs=[
            pl.BlockSpec((tile_src, out_pad), lambda i: (i, 0)),
            pl.BlockSpec((tile_src, 8), lambda i: (i, 0)),
        ],
        out_shape=[
            jax.ShapeDtypeStruct((n_src_pad, out_pad), bf16),
            jax.ShapeDtypeStruct((n_src_pad, 8), f32),
        ],
        compiler_params=pltpu.CompilerParams(
            dimension_semantics=("parallel",),
            vmem_limit_bytes=vmem_limit_bytes),
    )(h_pad, w_pad)

    # Per-node scores, f32 (O(N), XLA).
    s_src_row = s_all[:, 6].reshape(1, n_src_pad)
    s_dst_col = jnp.zeros((n_dst_pad, 1), f32).at[:n_dst, 0].set(s_all[:n_dst, 7])

    # Per-tile occupancy bitmap for sparsity skipping (single 1-B/elem read pass).
    # TODO(synk): precompute once per graph and reuse across layers / iterations.
    occ = lax.reduce_window(
        adj != 0, False, jnp.logical_or,
        window_dimensions=(tile_dst, tile_src),
        window_strides=(tile_dst, tile_src),
        padding=((0, n_dst_pad - n_dst), (0, n_src_pad - n_src)))
    occ = occ.reshape(-1).astype(jnp.int32)

    # ---- stage 2: tiled masked-softmax attention + aggregation ----
    if z_resident:
        z_spec = pl.BlockSpec((n_src_pad, out_pad), lambda di, si, occ: (0, 0))
    else:
        z_spec = pl.BlockSpec((tile_src, out_pad), lambda di, si, occ: (si, 0))

    flops = 2 * n_dst_pad * n_src_pad * out_pad + 8 * n_dst_pad * n_src_pad
    z_stream_bytes = z_bytes if z_resident else nd_t * n_src_pad * out_pad * 2
    bytes_accessed = (n_dst * n_src * adj.dtype.itemsize
                      + z_stream_bytes
                      + n_dst_pad * out_pad * 4)

    out_full = pl.pallas_call(
        make_attn_kernel(tile_src, n_src, z_resident, ragged_src),
        grid_spec=pltpu.PrefetchScalarGridSpec(
            num_scalar_prefetch=1,
            grid=(nd_t, ns_t),
            in_specs=[
                pl.BlockSpec((tile_dst, 1), lambda di, si, occ: (di, 0)),
                pl.BlockSpec((1, tile_src), lambda di, si, occ: (0, si)),
                pl.BlockSpec((tile_dst, tile_src), lambda di, si, occ: (di, si)),
                z_spec,
            ],
            out_specs=pl.BlockSpec((tile_dst, out_pad), lambda di, si, occ: (di, 0)),
            scratch_shapes=[
                pltpu.VMEM((tile_dst, 1), f32),        # running max m
                pltpu.VMEM((tile_dst, 1), f32),        # running sum l
                pltpu.VMEM((tile_dst, out_pad), f32),  # unnormalized accumulator
            ]),
        out_shape=jax.ShapeDtypeStruct((n_dst_pad, out_pad), f32),
        compiler_params=pltpu.CompilerParams(
            dimension_semantics=("parallel", "arbitrary"),
            vmem_limit_bytes=vmem_limit_bytes),
        cost_estimate=pl.CostEstimate(
            flops=flops,
            transcendentals=n_dst_pad * n_src_pad,
            bytes_accessed=bytes_accessed),
    )(occ, s_dst_col, s_src_row, adj, z_pad)

    out = out_full[:n_dst, :out_dim]
    if use_residual:
        out = out + z_pad[:n_dst, :out_dim].astype(f32)
    return out


# --------------------------------------------------------------------------- #
# Pure-JAX reference
# --------------------------------------------------------------------------- #
def gat_ref(h, fc_weight, attn_weight, adj, use_residual=False):
    out_dim = fc_weight.shape[0]
    n_dst = adj.shape[0]
    z = h @ fc_weight.T
    z_dst = z[:n_dst]
    s_src = z @ attn_weight[0, :out_dim]
    s_dst = z_dst @ attn_weight[0, out_dim:]
    logits = s_dst[:, None] + s_src[None, :]
    e = jnp.where(logits >= 0, logits, SLOPE * logits)
    e = jnp.where(adj > 0, e, -jnp.inf)
    alpha = jax.nn.softmax(e, axis=1)
    out = alpha @ z
    if use_residual:
        out = out + z_dst
    return out


if __name__ == "__main__":
    N_SRC, N_DST, IN_DIM, OUT_DIM = 64, 32, 16, 32

    key = jax.random.PRNGKey(0)
    k_h, k_fc, k_attn, k_adj = jax.random.split(key, 4)

    # Source node features.
    h = jax.random.normal(k_h, (N_SRC, IN_DIM), dtype=jnp.float32)

    # Deterministic xavier_normal_ init with gain = calculate_gain('relu') = sqrt(2).
    gain = math.sqrt(2.0)
    fc_std = gain * math.sqrt(2.0 / (IN_DIM + OUT_DIM))
    fc_weight = fc_std * jax.random.normal(k_fc, (OUT_DIM, IN_DIM), dtype=jnp.float32)
    attn_std = gain * math.sqrt(2.0 / (2 * OUT_DIM + 1))
    attn_weight = attn_std * jax.random.normal(k_attn, (1, 2 * OUT_DIM), dtype=jnp.float32)

    # int8 adjacency adj[dst, src] (preferred input format -> no O(N^2) repack in
    # the wrapper); every dst node keeps its self edge, as in a DGL block.
    rand_edges = jax.random.uniform(k_adj, (N_DST, N_SRC)) < 0.3
    self_edges = jnp.arange(N_DST)[:, None] == jnp.arange(N_SRC)[None, :]
    adj = (rand_edges | self_edges).astype(jnp.int8)

    # bf16 MXU operands (f32 accumulation) -> relaxed tolerance per review.
    tol = dict(atol=2e-2, rtol=2e-2)

    ref = gat_ref(h, fc_weight, attn_weight, adj, use_residual=False)

    out = jax.block_until_ready(gat_layer(h, fc_weight, attn_weight, adj))
    assert out.shape == (N_DST, OUT_DIM)
    assert jnp.allclose(out, ref, **tol), "mismatch vs reference (z-resident path)"

    out_stream = jax.block_until_ready(
        gat_layer(h, fc_weight, attn_weight, adj, z_resident=False))
    assert jnp.allclose(out_stream, ref, **tol), "mismatch vs reference (streamed-z path)"

    ref_res = gat_ref(h, fc_weight, attn_weight, adj, use_residual=True)
    out_res = jax.block_until_ready(
        gat_layer(h, fc_weight, attn_weight, adj, use_residual=True))
    assert jnp.allclose(out_res, ref_res, **tol), "residual mismatch"

    print("KERNEL_OK")
</pallas_src>

<mosaic_0001>
module attributes {stable_mosaic.version = 11 : i64} {
  func.func @proj_kernel(%arg0: i32, %arg1: memref<128x16xf32, #tpu.memory_space<vmem>>, %arg2: memref<16x128xf32, #tpu.memory_space<vmem>>, %arg3: memref<128x128xbf16, #tpu.memory_space<vmem>>, %arg4: memref<128x8xf32, #tpu.memory_space<vmem>>) attributes {dimension_semantics = [#tpu.dimension_semantics<parallel>], iteration_bounds = array<i64: 1>, scalar_prefetch = 0 : i64, scratch_operands = 0 : i64, tpu.core_type = #tpu.core_type<tc>, window_params = [{transform_indices = @transform_0, window_bounds = array<i64: 128, 16>}, {pipeline_mode = #tpu.pipeline_mode<synchronous>, transform_indices = @transform_1, window_bounds = array<i64: 16, 128>}, {transform_indices = @transform_2, window_bounds = array<i64: 128, 128>}, {transform_indices = @transform_3, window_bounds = array<i64: 128, 8>}]} {
    %c0 = arith.constant 0 : index
    %c0_0 = arith.constant 0 : index
    %0 = vector.load %arg1[%c0, %c0_0] : memref<128x16xf32, #tpu.memory_space<vmem>>, vector<128x16xf32>
    %c0_1 = arith.constant 0 : index
    %c0_2 = arith.constant 0 : index
    %1 = vector.load %arg2[%c0_1, %c0_2] : memref<16x128xf32, #tpu.memory_space<vmem>>, vector<16x128xf32>
    %cst = arith.constant dense<0.000000e+00> : vector<128x128xf32>
    %2 = tpu.matmul %0, %1, %cst {dimension_numbers = #tpu.dot_dimension_numbers<[1], [0], [0], [1], [0, 0, 1, 1], [], []>} : vector<128x16xf32>, vector<16x128xf32>, vector<128x128xf32> -> vector<128x128xf32>
    %3 = arith.truncf %2 : vector<128x128xf32> to vector<128x128xbf16>
    %c0_3 = arith.constant 0 : index
    %c0_4 = arith.constant 0 : index
    %4 = vector.load %arg3[%c0_3, %c0_4] : memref<128x128xbf16, #tpu.memory_space<vmem>>, vector<128x128xbf16>
    tpu.vector_store %arg3[%c0_3, %c0_4], %3 {strides = array<i32>} : memref<128x128xbf16, #tpu.memory_space<vmem>>, vector<128x128xbf16>,
    %5 = vector.extract_strided_slice %2 {offsets = [0, 120], sizes = [128, 8], strides = [1, 1]} : vector<128x128xf32> to vector<128x8xf32>
    %c0_5 = arith.constant 0 : index
    %c0_6 = arith.constant 0 : index
    %6 = vector.load %arg4[%c0_5, %c0_6] : memref<128x8xf32, #tpu.memory_space<vmem>>, vector<128x8xf32>
    tpu.vector_store %arg4[%c0_5, %c0_6], %5 {strides = array<i32>} : memref<128x8xf32, #tpu.memory_space<vmem>>, vector<128x8xf32>,
    return
  }
  func.func @transform_0(%arg0: i32) -> (i32, i32) {
    %c0_i32 = arith.constant 0 : i32
    %c0_i32_0 = arith.constant 0 : i32
    return %arg0, %c0_i32 : i32, i32
  }
  func.func @transform_1(%arg0: i32) -> (i32, i32) {
    %c0_i32 = arith.constant 0 : i32
    %c0_i32_0 = arith.constant 0 : i32
    %c0_i32_1 = arith.constant 0 : i32
    return %c0_i32, %c0_i32_0 : i32, i32
  }
  func.func @transform_2(%arg0: i32) -> (i32, i32) {
    %c0_i32 = arith.constant 0 : i32
    %c0_i32_0 = arith.constant 0 : i32
    return %arg0, %c0_i32 : i32, i32
  }
  func.func @transform_3(%arg0: i32) -> (i32, i32) {
    %c0_i32 = arith.constant 0 : i32
    %c0_i32_0 = arith.constant 0 : i32
    return %arg0, %c0_i32 : i32, i32
  }
}

</mosaic_0001>

<bundles_post_ra>
// kernel: tpu_custom_call.1
= control target key start
LH: loop header
LB: loop body
LE: loop exit
PB: predicated region body
PF: predicated region fallthrough
CT: control target
= control target key end

     0   :  { %vm32_vm0 = vcmask 130048   ;;  %s557_s0 = inlined_call_operand.vmem [shape: f32[128,16], index: 0, kind: input, shape index: {}]   ;;  %s558_s1 = inlined_call_operand.vmem [shape: f32[16,128], index: 1, kind: input, shape index: {}]   ;;  %s559_s2 = inlined_call_operand.hbm [shape: bf16[128,128], index: 2, kind: output, shape index: {0}]   ;;  %s560_s3 = inlined_call_operand.vmem [shape: f32[128,8], index: 3, kind: output, shape index: {1}]  }
   0x1   :  { %v31_v0 = vld [vmem:[%s558_s1 + $0x8] sm:$0xff]  ;;  %v30_v1 = vld [vmem:[%s558_s1] sm:$0xff] }
   0x2   :  { %95 = vmatpush.msra.mxu0 %v31_v0  ;;  %344 = vmatpush.msra.mxu1 %v31_v0  ;;  %v14_v2 = vld [vmem:[%s557_s0] sm:$0xff] }
   0x3   :  { %345 = vmatpush.msra.mxu2 %v31_v0  ;;  %346 = vmatpush.msra.mxu3 %v31_v0  ;;  %v18_v3 = vld [vmem:[%s557_s0 + $0x20] sm:$0xff] }
   0x4   :  { %v22_v4 = vld [vmem:[%s557_s0 + $0x40] sm:$0xff]  ;;  %96 = vmatpush.msra.mxu0 %v30_v1  ;;  %347 = vmatpush.msra.mxu1 %v30_v1 }
   0x5   :  { %348 = vmatpush.msra.mxu2 %v30_v1  ;;  %281 = vmatmul.msk.f32.vlgmr.msra.gmra.mxu0 %vm32_vm0, %v14_v2  ;;  %v26_v5 = vld [vmem:[%s557_s0 + $0x60] sm:$0xff] }
   0x6   :  { %285 = vmatmul.msk.f32.vlgmr.msra.gmra.mxu1 %vm32_vm0, %v18_v3  ;;  %289 = vmatmul.msk.f32.vlgmr.msra.gmra.mxu2 %vm32_vm0, %v22_v4 }
   0x7   :  { %349 = vmatpush.msra.mxu3 %v30_v1 }
   0x8   :  { %9 = vsyncpa [#allocation3], 0  ;;  %293 = vmatmul.msk.f32.vlgmr.msra.gmra.mxu3 %vm32_vm0, %v26_v5  ;;  %v15_v6 = vld [vmem:[%s557_s0 + $0x8] sm:$0xff]  ;;  %v16_v10 = vld [vmem:[%s557_s0 + $0x10] sm:$0xff]  ;;  %s380_s20 = smov 8   ;;  %s265_s23 = sshll.u32 %s559_s2, 4  ;;  %s266_s23 = int_to_ptr.hbm [resolvable:$true] %s265_s23 }
   0x9   :  { %v23_v7 = vld [vmem:[%s557_s0 + $0x48] sm:$0xff]  ;;  %v24_v11 = vld [vmem:[%s557_s0 + $0x50] sm:$0xff]  ;;  %v17_v14 = vld [vmem:[%s557_s0 + $0x18] sm:$0xff]  ;;  %s382_s24 = smov 64   ;;  %s383_s25 = smov 4   ;;  %vm242_vm1 = vcmask 64512  }
   0xa   :  { %v19_v8 = vld [vmem:[%s557_s0 + $0x28] sm:$0xff]  ;;  %v20_v12 = vld [vmem:[%s557_s0 + $0x30] sm:$0xff]  ;;  %v25_v15 = vld [vmem:[%s557_s0 + $0x58] sm:$0xff] }
   0xb   :  { %v27_v9 = vld [vmem:[%s557_s0 + $0x68] sm:$0xff]  ;;  %v28_v13 = vld [vmem:[%s557_s0 + $0x70] sm:$0xff]  ;;  %v21_v16 = vld [vmem:[%s557_s0 + $0x38] sm:$0xff] }
   0xc   :  { %v29_v17 = vld [vmem:[%s557_s0 + $0x78] sm:$0xff]  ;;  %s381_s0 = smov [#allocation2]  }
   0xd   :  { %282 = vmatmul.msk.f32.gmra.mxu0 %vm32_vm0, %v15_v6  ;;  %s263_s21 = sshll.u32 %s381_s0, 4  ;;  %s264_s21 = int_to_ptr.vmem [resolvable:$true] %s263_s21 }
   0xe   :  { %290 = vmatmul.msk.f32.gmra.mxu2 %vm32_vm0, %v23_v7  ;;  %286 = vmatmul.msk.f32.gmra.mxu1 %vm32_vm0, %v19_v8 }
  0x10   :  { %294 = vmatmul.msk.f32.gmra.mxu3 %vm32_vm0, %v27_v9 }
  0x15   :  { %283 = vmatmul.msk.f32.gmra.mxu0 %vm32_vm0, %v16_v10 }
  0x16   :  { %291 = vmatmul.msk.f32.gmra.mxu2 %vm32_vm0, %v24_v11  ;;  %287 = vmatmul.msk.f32.gmra.mxu1 %vm32_vm0, %v20_v12 }
  0x18   :  { %295 = vmatmul.msk.f32.gmra.mxu3 %vm32_vm0, %v28_v13 }
  0x1d   :  { %284 = vmatmul.msk.f32.gmra.mxu0 %vm32_vm0, %v17_v14 }
  0x1e   :  { %292 = vmatmul.msk.f32.gmra.mxu2 %vm32_vm0, %v25_v15  ;;  %288 = vmatmul.msk.f32.gmra.mxu1 %vm32_vm0, %v21_v16 }
  0x20   :  { %296 = vmatmul.msk.f32.gmra.mxu3 %vm32_vm0, %v29_v17 }
  0x82   :  { %v98_v18 = vpop.f32.mrf.mxu0 }
  0x83   :  { %v110_v19 = vpop.f32.mrf.mxu1  ;;  %194 = vrot.lane.b32.xlu0 %v98_v18, %s380_s20 }
  0x84   :  { %202 = vrot.lane.b32.xlu2 %v110_v19, %s380_s20 }
  0x89   :  { %v122_v20 = vpop.f32.mrf.mxu2 }
  0x8a   :  { %v101_v21 = vpop.f32.mrf.mxu0 }
  0x8b   :  { %v300_v22 = vpack.c.bf16 %v101_v21, %v98_v18  ;;  %v134_v23 = vpop.f32.mrf.mxu3  ;;  %v113_v24 = vpop.f32.mrf.mxu1 }
  0x8c   :  { %210 = vrot.lane.b32.xlu2 %v122_v20, %s380_s20  ;;  %218 = vrot.lane.b32.xlu0 %v134_v23, %s380_s20  ;;  %v310_v25 = vpack.c.bf16 %v113_v24, %v110_v19 }
  0x8d   :  { %301 = vst [vmem:[#allocation2] sm:$0xff] %v300_v22  }
  0x8e   :  { %338 = vst [vmem:[#allocation2 + $0x10] sm:$0xff] %v310_v25  }
  0x91   :  { %v125_v26 = vpop.f32.mrf.mxu2 }
  0x92   :  { %v320_v27 = vpack.c.bf16 %v125_v26, %v122_v20  ;;  %v104_v28 = vpop.f32.mrf.mxu0 }
  0x93   :  { %v137_v29 = vpop.f32.mrf.mxu3  ;;  %198 = vrot.lane.b32.xlu1 %v104_v28, %s380_s20  ;;  %v116_v30 = vpop.f32.mrf.mxu1 }
  0x94   :  { %340 = vst [vmem:[#allocation2 + $0x20] sm:$0xff] %v320_v27   ;;  %v330_v31 = vpack.c.bf16 %v137_v29, %v134_v23  ;;  %196 = vrot.lane.b32.xlu0 %v101_v21, %s380_s20  ;;  %204 = vrot.lane.b32.xlu2 %v113_v24, %s380_s20 }
  0x96   :  { %342 = vst [vmem:[#allocation2 + $0x30] sm:$0xff] %v330_v31  }
  0x99   :  { %v128_v32 = vpop.f32.mrf.mxu2 }
  0x9a   :  { %v107_v33 = vpop.f32.mrf.mxu0 }
  0x9b   :  { %v305_v34 = vpack.c.bf16 %v107_v33, %v104_v28  ;;  %214 = vrot.lane.b32.xlu1 %v128_v32, %s380_s20  ;;  %v119_v35 = vpop.f32.mrf.mxu1  ;;  %v140_v36 = vpop.f32.mrf.mxu3 }
  0x9c   :  { %212 = vrot.lane.b32.xlu0 %v125_v26, %s380_s20  ;;  %v315_v37 = vpack.c.bf16 %v119_v35, %v116_v30 }
  0x9d   :  { %337 = vst [vmem:[#allocation2 + $0x8] sm:$0xff] %v305_v34  }
  0x9e   :  { %339 = vst [vmem:[#allocation2 + $0x18] sm:$0xff] %v315_v37  }
  0xa1   :  { %v131_v38 = vpop.f32.mrf.mxu2 }
  0xa2   :  { %v325_v39 = vpack.c.bf16 %v131_v38, %v128_v32  ;;  %216 = vrot.lane.b32.xlu2 %v131_v38, %s380_s20 }
  0xa3   :  { %200 = vrot.lane.b32.xlu1 %v107_v33, %s380_s20  ;;  %v143_v40 = vpop.f32.mrf.mxu3 }
  0xa4   :  { %341 = vst [vmem:[#allocation2 + $0x28] sm:$0xff] %v325_v39   ;;  %206 = vrot.lane.b32.xlu0 %v116_v30, %s380_s20  ;;  %v335_v41 = vpack.c.bf16 %v143_v40, %v140_v36 }
  0xa6   :  { %343 = vst [vmem:[#allocation2 + $0x38] sm:$0xff] %v335_v41  }
  0xa7   :  { %271 = dma.vmem_to_hbm [thread:$0]  %s264_s21, 1024, %s266_s23, [#allocation3], %s382_s24, %s382_s24, %s383_s25  }
  0xaa   :  { %222 = vrot.lane.b32.xlu2 %v140_v36, %s380_s20 }
  0xab   :  { %208 = vrot.lane.b32.xlu1 %v119_v35, %s380_s20 }
  0xac   :  { %224 = vrot.lane.b32.xlu0 %v143_v40, %s380_s20 }
  0xb3   :  { %220 = vrot.lane.b32.xlu1 %v137_v29, %s380_s20 }
  0xde   :  { %v203_v42 = vpop.permute.xlu2 %202 }
  0xdf   :  { %247 = vst.msk [vmem:[%s560_s3 + $0x20] sm:$0xff] %vm242_vm1, %v203_v42 }
  0xe6   :  { %v211_v43 = vpop.permute.xlu2 %210 }
  0xe7   :  { %251 = vst.msk [vmem:[%s560_s3 + $0x40] sm:$0xff] %vm242_vm1, %v211_v43 }
  0xee   :  { %v205_v44 = vpop.permute.xlu2 %204 }
  0xef   :  { %248 = vst.msk [vmem:[%s560_s3 + $0x28] sm:$0xff] %vm242_vm1, %v205_v44 }
  0xf5   :  { %v195_v45 = vpop.permute.xlu0 %194 }
  0xf6   :  { %243 = vst.msk [vmem:[%s560_s3] sm:$0xff] %vm242_vm1, %v195_v45 }
  0xfc   :  { %v217_v46 = vpop.permute.xlu2 %216 }
  0xfd   :  { %254 = vst.msk [vmem:[%s560_s3 + $0x58] sm:$0xff] %vm242_vm1, %v217_v46 }
  0xfe   :  { %v219_v47 = vpop.permute.xlu0 %218 }
  0xff   :  { %255 = vst.msk [vmem:[%s560_s3 + $0x60] sm:$0xff] %vm242_vm1, %v219_v47 }
 0x104   :  { %v223_v48 = vpop.permute.xlu2 %222 }
 0x105   :  { %257 = vst.msk [vmem:[%s560_s3 + $0x70] sm:$0xff] %vm242_vm1, %v223_v48  ;;  %v199_v49 = vpop.permute.xlu1 %198 }
 0x106   :  { %v197_v50 = vpop.permute.xlu0 %196  ;;  %245 = vst.msk [vmem:[%s560_s3 + $0x10] sm:$0xff] %vm242_vm1, %v199_v49 }
 0x107   :  { %244 = vst.msk [vmem:[%s560_s3 + $0x8] sm:$0xff] %vm242_vm1, %v197_v50 }
 0x10d   :  { %v215_v51 = vpop.permute.xlu1 %214 }
 0x10e   :  { %v213_v52 = vpop.permute.xlu0 %212  ;;  %253 = vst.msk [vmem:[%s560_s3 + $0x50] sm:$0xff] %vm242_vm1, %v215_v51 }
 0x10f   :  { %252 = vst.msk [vmem:[%s560_s3 + $0x48] sm:$0xff] %vm242_vm1, %v213_v52 }
 0x115   :  { %v201_v53 = vpop.permute.xlu1 %200 }
 0x116   :  { %v207_v54 = vpop.permute.xlu0 %206  ;;  %246 = vst.msk [vmem:[%s560_s3 + $0x18] sm:$0xff] %vm242_vm1, %v201_v53 }
 0x117   :  { %249 = vst.msk [vmem:[%s560_s3 + $0x30] sm:$0xff] %vm242_vm1, %v207_v54 }
 0x11d   :  { %v209_v55 = vpop.permute.xlu1 %208 }
 0x11e   :  { %250 = vst.msk [vmem:[%s560_s3 + $0x38] sm:$0xff] %vm242_vm1, %v209_v55  ;;  %v225_v56 = vpop.permute.xlu0 %224 }
 0x11f   :  { %258 = vst.msk [vmem:[%s560_s3 + $0x78] sm:$0xff] %vm242_vm1, %v225_v56 }
 0x125   :  { %v221_v57 = vpop.permute.xlu1 %220 }
 0x126   :  { %256 = vst.msk [vmem:[%s560_s3 + $0x68] sm:$0xff] %vm242_vm1, %v221_v57 }
 0x127   :  { %378 = dma.done.wait [#allocation3], 1024  }
 0x128   :  { %379 = vsyncadd [#allocation3], 4294966272 }
 0x129   :  { %280 = vsyncpa [#allocation3], 1 }

</bundles_post_ra>
